<compile_context>
chip_gen: v7x
topology: tpu7x:2x2x1
jax: 0.10.0
libtpu: 0.0.40
codegen_flags: <defaults>
</compile_context>

<pallas_src>
import functools

import jax
import jax.numpy as jnp
from jax.experimental import pallas as pl
from jax.experimental.pallas import tpu as pltpu


def _det_head_kernel(x_ref, w_ref, b_ref, o_ref, *, nb):
    # x_ref: (nb, C_in, TILE_P)   w_ref: (C_out, C_in)   b_ref: (C_out, 1) f32
    # o_ref: (nb, C_out, TILE_P)
    w = w_ref[...]
    bcol = b_ref[...].astype(jnp.float32)            # (C_out, 1)

    # nb is a small static int -> plain unrolled loop over the leading dim.
    for bi in range(nb):
        x = x_ref[bi]                                 # (C_in, TILE_P)
        # Tiny-K contraction; kernel is HBM-bound so MXU occupancy is irrelevant.
        acc = jnp.dot(w, x, preferred_element_type=jnp.float32) + bcol

        # Static per-output-channel activation split (channels on sublanes):
        #   rows 0:2 sigmoid, rows 2:4 exp, rows 4: sigmoid.
        # sigmoid via single-transcendental tanh form (1 EUP push instead of
        # exp + reciprocal) so v7x stays HBM-bound.
        sig_lo = 0.5 * jnp.tanh(0.5 * acc[0:2, :]) + 0.5
        expv = jnp.exp(acc[2:4, :])
        sig_hi = 0.5 * jnp.tanh(0.5 * acc[4:, :]) + 0.5

        o_ref[bi, 0:2, :] = sig_lo.astype(o_ref.dtype)
        o_ref[bi, 2:4, :] = expv.astype(o_ref.dtype)
        o_ref[bi, 4:, :] = sig_hi.astype(o_ref.dtype)


def detection_head_pallas(x_nchw, weight, bias, *,
                          max_tile_px=65536,
                          max_batch_block=16,
                          vmem_block_budget_bytes=8 * 1024 * 1024,
                          out_dtype=None):
    """Forward pass of DetectionHead.

    x_nchw: (N, C_in, H, W)
    weight: (C_out, C_in) or (C_out, C_in, 1, 1)   (1x1 conv kernel)
    bias:   (C_out,)
    Returns (N, C_out, H, W) in `out_dtype` (defaults to x dtype).
    """
    n, c_in, h, w = x_nchw.shape
    c_out = bias.shape[0]
    hw = h * w
    out_dtype = x_nchw.dtype if out_dtype is None else out_dtype

    # Free reshape: NCHW already has channels-on-sublanes / pixels-on-lanes.
    x3 = x_nchw.reshape(n, c_in, hw)
    w_mat = weight.reshape(c_out, c_in).astype(x_nchw.dtype)
    b_col = bias.reshape(c_out, 1).astype(jnp.float32)

    # ---- VMEM-aware tile sizing (per pipeline buffer) -----------------------
    isz_in = jnp.dtype(x_nchw.dtype).itemsize
    isz_out = jnp.dtype(out_dtype).itemsize
    # input block + output block + f32 accumulator/temps, per pixel.
    bytes_per_px = c_in * isz_in + c_out * isz_out + 2 * c_out * 4
    max_px = min(int(max_tile_px), max(128, vmem_block_budget_bytes // bytes_per_px))
    max_px = max(128, (max_px // 128) * 128)

    # Lane-dense pixel tile (multiple of 128); the last pixel block may be
    # partial — no host-side padding, Pallas clips OOB reads/writes.
    tile_p = min(max_px, pl.cdiv(hw, 128) * 128)
    n_ptiles = pl.cdiv(hw, tile_p)

    # Batch blocking for small feature maps so each grid step moves enough
    # bytes to amortize the fixed per-step pipeline overhead.
    nb = max(1, min(n, max_px // tile_p, int(max_batch_block)))
    # Keep >= 2 grid steps when possible so v7x's two TensorCores both get work.
    if n_ptiles * pl.cdiv(n, nb) < 2 and n > 1:
        nb = pl.cdiv(n, 2)
    n_btiles = pl.cdiv(n, nb)

    kernel = functools.partial(_det_head_kernel, nb=nb)

    out3 = pl.pallas_call(
        kernel,
        out_shape=jax.ShapeDtypeStruct((n, c_out, hw), out_dtype),
        grid_spec=pltpu.PrefetchScalarGridSpec(
            num_scalar_prefetch=0,
            grid=(n_btiles, n_ptiles),
            in_specs=[
                pl.BlockSpec((nb, c_in, tile_p), lambda b, p: (b, 0, p)),
                pl.BlockSpec((c_out, c_in), lambda b, p: (0, 0)),
                pl.BlockSpec((c_out, 1), lambda b, p: (0, 0)),
            ],
            out_specs=pl.BlockSpec((nb, c_out, tile_p), lambda b, p: (b, 0, p)),
        ),
        compiler_params=pltpu.CompilerParams(
            dimension_semantics=("parallel", "parallel"),
            vmem_limit_bytes=48 * 1024 * 1024,
        ),
    )(x3, w_mat, b_col)

    # (N, C_out, H*W) -> NCHW is a pure (free) reshape.
    return out3.reshape(n, c_out, h, w)


def _reference(x_nchw, weight, bias):
    # Pure-JAX reference of the PyTorch forward.
    n, c_in, h, w = x_nchw.shape
    c_out = bias.shape[0]
    xf = jnp.transpose(x_nchw, (0, 2, 3, 1)).reshape(-1, c_in)
    out = xf @ weight.reshape(c_out, c_in).T + bias
    ch = jnp.arange(c_out)
    sig = jax.nn.sigmoid(out)
    expv = jnp.exp(out)
    out = jnp.where((ch >= 2) & (ch < 4), expv, sig)
    return jnp.transpose(out.reshape(n, h, w, c_out), (0, 3, 1, 2))


if __name__ == "__main__":
    # Module config (small demo shapes).
    in_channels = 4
    num_classes = 3
    c_out = 5 + num_classes          # = 8

    key = jax.random.PRNGKey(0)
    kw_, kb_, kx1, kx2 = jax.random.split(key, 4)

    # Deterministic 1x1-conv params (PyTorch Conv2d default init range).
    bound = 1.0 / (in_channels ** 0.5)
    weight = jax.random.uniform(kw_, (c_out, in_channels, 1, 1), jnp.float32,
                                -bound, bound)
    bias = jax.random.uniform(kb_, (c_out,), jnp.float32, -bound, bound)

    cases = [
        jax.random.normal(kx1, (2, in_channels, 16, 16), jnp.float32),
        # Ragged H*W (169 px, not a multiple of 128) + odd batch: exercises the
        # in-kernel tail handling and batch blocking.
        jax.random.normal(kx2, (3, in_channels, 13, 13), jnp.float32),
    ]

    for x in cases:
        out = jax.block_until_ready(detection_head_pallas(x, weight, bias))
        ref = _reference(x, weight, bias)
        assert out.shape == ref.shape
        assert jnp.allclose(out, ref, atol=1e-5, rtol=1e-5), \
            float(jnp.max(jnp.abs(out - ref)))

    print("KERNEL_OK")
</pallas_src>

<mosaic_0001>
module attributes {stable_mosaic.version = 11 : i64} {
  func.func @_det_head_kernel(%arg0: i32, %arg1: i32, %arg2: memref<1x4x256xf32, #tpu.memory_space<vmem>>, %arg3: memref<8x4xf32, #tpu.memory_space<vmem>>, %arg4: memref<8x1xf32, #tpu.memory_space<vmem>>, %arg5: memref<1x8x256xf32, #tpu.memory_space<vmem>>) attributes {dimension_semantics = [#tpu.dimension_semantics<parallel>, #tpu.dimension_semantics<parallel>], iteration_bounds = array<i64: 2, 1>, scalar_prefetch = 0 : i64, scratch_operands = 0 : i64, tpu.core_type = #tpu.core_type<tc>, window_params = [{transform_indices = @transform_0, window_bounds = array<i64: 1, 4, 256>}, {pipeline_mode = #tpu.pipeline_mode<synchronous>, transform_indices = @transform_1, window_bounds = array<i64: 8, 4>}, {pipeline_mode = #tpu.pipeline_mode<synchronous>, transform_indices = @transform_2, window_bounds = array<i64: 8, 1>}, {transform_indices = @transform_3, window_bounds = array<i64: 1, 8, 256>}]} {
    %c0 = arith.constant 0 : index
    %c0_0 = arith.constant 0 : index
    %0 = vector.load %arg3[%c0, %c0_0] : memref<8x4xf32, #tpu.memory_space<vmem>>, vector<8x4xf32>
    %c0_1 = arith.constant 0 : index
    %c0_2 = arith.constant 0 : index
    %1 = vector.load %arg4[%c0_1, %c0_2] : memref<8x1xf32, #tpu.memory_space<vmem>>, vector<8x1xf32>
    %c0_3 = arith.constant 0 : index
    %c0_4 = arith.constant 0 : index
    %c0_5 = arith.constant 0 : index
    %2 = vector.load %arg2[%c0_3, %c0_4, %c0_5] : memref<1x4x256xf32, #tpu.memory_space<vmem>>, vector<1x4x256xf32>
    %3 = vector.shape_cast %2 : vector<1x4x256xf32> to vector<4x256xf32>
    %cst = arith.constant dense<0.000000e+00> : vector<8x256xf32>
    %4 = tpu.matmul %0, %3, %cst {dimension_numbers = #tpu.dot_dimension_numbers<[1], [0], [0], [1], [0, 0, 1, 1], [], []>} : vector<8x4xf32>, vector<4x256xf32>, vector<8x256xf32> -> vector<8x256xf32>
    %5 = vector.broadcast %1 : vector<8x1xf32> to vector<8x256xf32>
    %6 = arith.addf %4, %5 : vector<8x256xf32>
    %7 = vector.extract_strided_slice %6 {offsets = [0, 0], sizes = [2, 256], strides = [1, 1]} : vector<8x256xf32> to vector<2x256xf32>
    %cst_6 = arith.constant 5.000000e-01 : f32
    %8 = vector.broadcast %cst_6 : f32 to vector<2x256xf32>
    %9 = arith.mulf %8, %7 : vector<2x256xf32>
    %10 = math.tanh %9 : vector<2x256xf32>
    %cst_7 = arith.constant 5.000000e-01 : f32
    %11 = vector.broadcast %cst_7 : f32 to vector<2x256xf32>
    %12 = arith.mulf %11, %10 : vector<2x256xf32>
    %cst_8 = arith.constant 5.000000e-01 : f32
    %13 = vector.broadcast %cst_8 : f32 to vector<2x256xf32>
    %14 = arith.addf %12, %13 : vector<2x256xf32>
    %15 = vector.extract_strided_slice %6 {offsets = [2, 0], sizes = [2, 256], strides = [1, 1]} : vector<8x256xf32> to vector<2x256xf32>
    %16 = math.exp %15 : vector<2x256xf32>
    %17 = vector.extract_strided_slice %6 {offsets = [4, 0], sizes = [4, 256], strides = [1, 1]} : vector<8x256xf32> to vector<4x256xf32>
    %cst_9 = arith.constant 5.000000e-01 : f32
    %18 = vector.broadcast %cst_9 : f32 to vector<4x256xf32>
    %19 = arith.mulf %18, %17 : vector<4x256xf32>
    %20 = math.tanh %19 : vector<4x256xf32>
    %cst_10 = arith.constant 5.000000e-01 : f32
    %21 = vector.broadcast %cst_10 : f32 to vector<4x256xf32>
    %22 = arith.mulf %21, %20 : vector<4x256xf32>
    %cst_11 = arith.constant 5.000000e-01 : f32
    %23 = vector.broadcast %cst_11 : f32 to vector<4x256xf32>
    %24 = arith.addf %22, %23 : vector<4x256xf32>
    %c0_12 = arith.constant 0 : index
    %c0_13 = arith.constant 0 : index
    %c0_14 = arith.constant 0 : index
    %25 = vector.load %arg5[%c0_12, %c0_13, %c0_14] : memref<1x8x256xf32, #tpu.memory_space<vmem>>, vector<1x2x256xf32>
    %26 = vector.shape_cast %25 : vector<1x2x256xf32> to vector<2x256xf32>
    %27 = vector.shape_cast %14 : vector<2x256xf32> to vector<1x2x256xf32>
    tpu.vector_store %arg5[%c0_12, %c0_13, %c0_14], %27 {strides = array<i32>} : memref<1x8x256xf32, #tpu.memory_space<vmem>>, vector<1x2x256xf32>,
    %c0_15 = arith.constant 0 : index
    %c2 = arith.constant 2 : index
    %c0_16 = arith.constant 0 : index
    %28 = vector.load %arg5[%c0_15, %c2, %c0_16] : memref<1x8x256xf32, #tpu.memory_space<vmem>>, vector<1x2x256xf32>
    %29 = vector.shape_cast %28 : vector<1x2x256xf32> to vector<2x256xf32>
    %30 = vector.shape_cast %16 : vector<2x256xf32> to vector<1x2x256xf32>
    tpu.vector_store %arg5[%c0_15, %c2, %c0_16], %30 {strides = array<i32>} : memref<1x8x256xf32, #tpu.memory_space<vmem>>, vector<1x2x256xf32>,
    %c0_17 = arith.constant 0 : index
    %c4 = arith.constant 4 : index
    %c0_18 = arith.constant 0 : index
    %31 = vector.load %arg5[%c0_17, %c4, %c0_18] : memref<1x8x256xf32, #tpu.memory_space<vmem>>, vector<1x4x256xf32>
    %32 = vector.shape_cast %31 : vector<1x4x256xf32> to vector<4x256xf32>
    %33 = vector.shape_cast %24 : vector<4x256xf32> to vector<1x4x256xf32>
    tpu.vector_store %arg5[%c0_17, %c4, %c0_18], %33 {strides = array<i32>} : memref<1x8x256xf32, #tpu.memory_space<vmem>>, vector<1x4x256xf32>,
    return
  }
  func.func @transform_0(%arg0: i32, %arg1: i32) -> (i32, i32, i32) {
    %c0_i32 = arith.constant 0 : i32
    %c0_i32_0 = arith.constant 0 : i32
    return %arg0, %c0_i32, %arg1 : i32, i32, i32
  }
  func.func @transform_1(%arg0: i32, %arg1: i32) -> (i32, i32) {
    %c0_i32 = arith.constant 0 : i32
    %c0_i32_0 = arith.constant 0 : i32
    %c0_i32_1 = arith.constant 0 : i32
    return %c0_i32, %c0_i32_0 : i32, i32
  }
  func.func @transform_2(%arg0: i32, %arg1: i32) -> (i32, i32) {
    %c0_i32 = arith.constant 0 : i32
    %c0_i32_0 = arith.constant 0 : i32
    %c0_i32_1 = arith.constant 0 : i32
    return %c0_i32, %c0_i32_0 : i32, i32
  }
  func.func @transform_3(%arg0: i32, %arg1: i32) -> (i32, i32, i32) {
    %c0_i32 = arith.constant 0 : i32
    %c0_i32_0 = arith.constant 0 : i32
    return %arg0, %c0_i32, %arg1 : i32, i32, i32
  }
}

</mosaic_0001>

<bundles_post_ra>
// kernel: tpu_custom_call.1
= control target key start
LH: loop header
LB: loop body
LE: loop exit
PB: predicated region body
PF: predicated region fallthrough
CT: control target
= control target key end

     0   :  { %8 = vsyncpa [#allocation3], 0  ;;  %s707_s0 = inlined_call_operand.vmem [shape: f32[2,4,256], index: 0, kind: input, shape index: {}]   ;;  %s708_s1 = inlined_call_operand.vmem [shape: f32[8,4], index: 1, kind: input, shape index: {}]   ;;  %s709_s2 = inlined_call_operand.vmem [shape: f32[8,1], index: 2, kind: input, shape index: {}]   ;;  %s710_s3 = inlined_call_operand.hbm [shape: f32[2,8,256], index: 3, kind: output, shape index: {}]  }
   0x1   :  { %10 = vsyncpa [#allocation3 + $0x1], 0  ;;  %s589_s12 = smov 0   ;;  %s591_s13 = smov 0  }
   0x2   :  { %s593_s14 = smov 0   ;;  %s595_s15 = smov 0  }
   0x3   :  { %s597_s16 = smov 0   ;;  %s599_s17 = smov 0  }
   0x4 LB: > { %s401_s18 = sadd.s32 4294967295, %s564_s17   ;;  %s402_s19 = sadd.s32 4294967294, %s564_s17   ;;  %s564_s17 = sphi %s599_s17, %s16_s17   ;;  %s560_s16 = sphi %s597_s16, %s717_s16   ;;  %s556_s15 = sphi %s595_s15, %s716_s15   ;;  %s552_s14 = sphi %s593_s14, %s715_s14   ;;  %s548_s13 = sphi %s591_s13, %s714_s13   ;;  %s544_s12 = sphi %s589_s12, %s713_s12  }
   0x5   : > { %s28_s20 = sadd.s32 1, %s560_s16  ;;  %s107_s21 = sadd.s32 1, %s552_s14 }
   0x6   : > { %p30_p0 = scmp.ge.s32.totalorder %s28_s20, 2  ;;  %p117_p1 = scmp.ne.s32.totalorder %s552_s14, %s548_s13 }
   0x7   : > { %p118_p2 = scmp.eq.s32.totalorder %s401_s18, 1  ;;  %p123_p3 = scmp.ne.s32.totalorder %s548_s13, %s544_s12 }
   0x8   : > { %s719_s20 = smov (%p30_p0, %s28_s20), 0  ;;  %p124_p5 = scmp.eq.s32.totalorder %s402_s19, 1 }
   0x9   : > { %p629_p4 = por %p118_p2, %p117_p1  ;;  %s102_s23 = ssub.s32 %s560_s16, %s719_s20 }
   0xa   : > { %p405_p6 = scmp.ge.s32.totalorder %s564_s17, 1  ;;  %p105_p7 = scmp.eq.s32.totalorder %s102_s23, 0 }
   0xb   : > { %p636_p8 = por %p124_p5, %p123_p3  ;;  %p161_p9 = scmp.lt.s32.totalorder %s564_s17, 3 }
   0xc   : > { %s642_s25 = scalar_select %p105_p7, %s552_s14, %s107_s21  }
   0xd   : > { %p162_p10 = pnand %p405_p6, %p161_p9 }
   0xe   : > { %p190_p11 = scmp.lt.s32.totalorder (!%p162_p10), %s556_s15, 1  ;;  %v566_v0 = vmov (!%p162_p10), 0.0   ;;  %v567_v1 = vmov (!%p162_p10), 0   ;;  %v201_v2 = vld [vmem:[%s709_s2] sm:$0xff] (!%p162_p10)  ;;  %vm214_vm0 = vcmask (!%p162_p10), 1043456   ;;  %vm210_vm1 = vcmask (!%p162_p10), 31744  }
   0xf   : > { %165 = sbr.rel (%p162_p10) target bundleno = 278 (0x116), region = 32  ;;  %283 = vmatprep.mubr.f32.mxu0 (!%p162_p10), %v566_v0  ;;  %476 = vset.pattern.permute.xlu0 (!%p162_p10), %v567_v1  ;;  %v200_v5 = vld [vmem:[%s708_s1] sm:$0xff] (!%p162_p10)  ;;  %s186_s8 = sand.u32 (!%p162_p10), 1, %s548_s13  }
  0x10   : > { %205 = vperm.xlu0 (!%p162_p10), %476, %v201_v2   ;;  %s406_s9 = sshll.u32 (!%p162_p10), %s186_s8, 4  ;;  %s418_s11 = sshll.u32 (!%p162_p10), %s556_s15, 8 }
  0x11   : > { %s188_s10 = scalar_lea.vmem (!%p162_p10), [#allocation2], %s406_s9  ;;  %s660_s23 = scalar_lea.hbm (!%p162_p10), %s710_s3, %s418_s11 }
  0x12   : > { %s325_s18 = sshll.u32 (!%p162_p10), %s188_s10, 4  ;;  %s309_s26 = scalar_lea.sflag (!%p162_p10), [#allocation3], %s186_s8  ;;  %s662_s18 = int_to_ptr.vmem [resolvable:$true] %s325_s18 }
  0x13   : > { %s568_s27 = smov (!%p162_p10), [#allocation2]  }
  0x16   : > { %s191_s28 = scalar_select %p190_p11, %s556_s15, 1 }
  0x17   : > { %s486_s15 = scalar_lea.vmem %s662_s18, 256 }
  0x18   : > { %s417_s29 = sshll.u32 %s191_s28, 3  ;;  %p487_p12 = scmp.ne.s32.totalorder %s662_s18, %s486_s15 }
  0x19   : > { %s197_s5 = scalar_lea.vmem %s707_s0, %s417_s29  ;;  %s490_s28 = sshll.u32 %s568_s27, 4  ;;  %s491_s28 = int_to_ptr.vmem [resolvable:$false] %s490_s28 }
  0x1a   : > { %v202_v3 = vld [vmem:[%s197_s5] sm:$0xff]  ;;  %p488_p13 = pnand %p487_p12, %p629_p4  ;;  %s492_s29 = scalar_lea.vmem %s491_s28, 512 }
  0x1b   : > { %v209_v4 = vcombine.high %v202_v3, %v202_v3  ;;  %p493_p1 = scmp.lt.s32.totalorder %s662_s18, %s491_s28  ;;  %p494_p2 = scmp.lt.s32.totalorder %s492_s29, %s486_s15 }
  0x1c   : > { %p489_p0 = pneg %p488_p13 }
  0x1d   : > { %409 = vmatprep.subr.msk.mxu0 %vm214_vm0, %v209_v4  ;;  %p495_p3 = por %p494_p2, %p493_p1 }
  0x1e   : > { %410 = vmatpush1.msk.msra.mxu0 %vm214_vm0, %v202_v3 }
  0x1f   : > { %411 = vmatmul.mubr.msk.f32.vlgmr.msra.gmra.mrb[0].mxu0 %vm210_vm1, %v200_v5  ;;  %p496_p5 = pnand %p495_p3, %p489_p0 }
  0x8f   : > { %v206_v6 = vpop.permute.xlu0 %205 }
  0xf2   : > { %v285_v7 = vpop.f32.mrb[0].mxu0 }
  0xf3   : > { %v286_v8 = vadd.f32 %v285_v7, %v206_v6  ;;  %v287_v9 = vpop.f32.mrb[1].mxu0 }
  0xf4   : > { %v288_v10 = vadd.f32 %v287_v9, %v206_v6 }
  0xf5   : > { %v290_v11 = vmul.f32 0.5, %v286_v8  ;;  %v298_v12 = vmul.f32 1.442695, %v286_v8 }
  0xf6   : > { %v291_v13 = vmul.f32 0.5, %v288_v10  ;;  %v300_v14 = vmul.f32 1.442695, %v288_v10 }
  0xf7   : > { %478 = vtanh.f32 %v290_v11 }
  0xf8   : > { %480 = vpow2.f32 %v298_v12 }
  0xf9   : > { %482 = vtanh.f32 %v291_v13 }
  0xfa   : > { %484 = vpow2.f32 %v300_v14 }
 0x101   : > { %v479_v15 = vpop.eup %478 }
 0x102   : > { %v481_v16 = vpop.eup %480  ;;  %v294_v17 = vmul.f32 0.5, %v479_v15 }
 0x103   : > { %v483_v18 = vpop.eup %482  ;;  %304 = vst [vmem:[%s188_s10] sm:$0xc] %v481_v16 }
 0x104   : > { %v485_v19 = vpop.eup %484  ;;  %v296_v20 = vadd.f32 0.5, %v294_v17  ;;  %v295_v21 = vmul.f32 0.5, %v483_v18 }
 0x105   : > { %305 = vst [vmem:[%s188_s10 + $0x8] sm:$0xc] %v485_v19 }
 0x106   : > { %302 = vst [vmem:[%s188_s10] sm:$0xf3] %v296_v20   ;;  %v297_v22 = vadd.f32 0.5, %v295_v21 }
 0x108   : > { %303 = vst [vmem:[%s188_s10 + $0x8] sm:$0xf3] %v297_v22  }
 0x109   : > { %499 = shalt.err (!%p496_p5)
}
 0x10a   : > { %s500_s30 = scalar_lea.hbm %s660_s23, 256  ;;  %s504_s6 = scalar_lea.hbm %s710_s3, 512 }
 0x10b   : > { %p501_p6 = scmp.ne.s32.totalorder %s660_s23, %s500_s30  ;;  %p505_p10 = scmp.lt.u32.totalorder %s660_s23, %s710_s3 }
 0x10c   : > { %p506_p11 = scmp.lt.u32.totalorder %s504_s6, %s500_s30  ;;  %p508_p13 = scmp.lt.u32.totalorder %s500_s30, %s660_s23 }
 0x10d   : > { %p502_p7 = pnand %p501_p6, %p629_p4 }
 0x10e   : > { %p507_p12 = por %p506_p11, %p505_p10 }
 0x10f   : > { %p503_p9 = pneg %p502_p7 }
 0x110   : > { %p509_p0 = por %p508_p13, %p507_p12 }
 0x112   : > { %p510_p1 = pnand %p509_p0, %p503_p9 }
 0x114   : > { %513 = shalt.err (!%p510_p1)
}
 0x115   : > { %419 = dma.vmem_to_hbm [thread:$0]  (%p629_p4), %s662_s18, 256, %s660_s23, %s309_s26  }
 0x116 PF: > { %p425_p2 = scmp.ge.s32.totalorder %s564_s17, 2  ;;  %s337_s9 = sand.u32 1, %s544_s12  }
 0x117   : > { %s338_s10 = scalar_lea.sflag [#allocation3], %s337_s9 }
 0x118   : > { %p422_p3 = pnand %p425_p2, %p636_p8 }
 0x11a   : > { %539 = dma.done.wait (!%p422_p3), %s338_s10, 256  }
 0x11b   : > { %541 = vsyncadd (!%p422_p3), %s338_s10, 4294967040  ;;  %s16_s17 = sadd.s32 1, %s564_s17   ;;  %s713_s12 = smov %s548_s13 }
 0x11c   : > { %p13_p5 = scmp.ge.s32.totalorder %s16_s17, 4   ;;  %s714_s13 = smov %s552_s14 }
 0x11d   : > { %s715_s14 = smov %s642_s25  ;;  %s716_s15 = smov %s560_s16 }
 0x11e   : > { %s717_s16 = smov %s719_s20  ;;  %15 = sbr.rel (!%p13_p5) target bundleno = 4 (0x4), region = 67 }
 0x125   :  { %343 = vsyncpa [#allocation3], 1 }
 0x126   :  { %345 = vsyncpa [#allocation3 + $0x1], 1 }

</bundles_post_ra>
